<compile_context>
chip_gen: v7x
topology: tpu7x:2x2x1
jax: 0.10.0
libtpu: 0.0.40
codegen_flags: <defaults>
</compile_context>

<pallas_src>
import jax
import jax.numpy as jnp
from jax.experimental import pallas as pl
from jax.experimental.pallas import tpu as pltpu

_LANE = 512                         # lane-dense width (multiple of 128)
_MAX_TILE_BYTES = 4 * 1024 * 1024   # ~4 MiB per tile (per buffer)
_VMEM_LIMIT_BYTES = 48 << 20        # explicit scoped-VMEM limit (safe on v5e/v6e/v7x)


def _cdiv(a, b):
    return -(-a // b)


def _bias_kernel(bias_ref, x_ref, o_ref):
    # bias_ref: (1,) f32 in SMEM.  x_ref / o_ref: VMEM tile (2-D or 1-D).
    # Accumulate in f32, cast back to the tensor dtype (no-op for f32 inputs).
    o_ref[...] = (x_ref[...].astype(jnp.float32) + bias_ref[0]).astype(o_ref.dtype)


def _compiler_params():
    return pltpu.CompilerParams(
        dimension_semantics=("parallel",),
        vmem_limit_bytes=_VMEM_LIMIT_BYTES,
    )


def _bias_2d(flat, bias_smem, n, dtype):
    """Lane-dense (rows, 512) slab path; requires n % _LANE == 0."""
    rows = n // _LANE
    itemsize = jnp.dtype(dtype).itemsize
    max_tile_rows = max(8, (_MAX_TILE_BYTES // (_LANE * itemsize)) // 8 * 8)

    if rows <= 8:
        tile_rows = rows                       # single tile; block == full array dims
    else:
        # Aim for >= ~4 pipeline steps; tile_rows a multiple of 8, capped at ~4 MiB.
        target = _cdiv(_cdiv(rows, 4), 8) * 8
        tile_rows = max(8, min(max_tile_rows, target))
    num_tiles = _cdiv(rows, tile_rows)         # ragged last row-block handled by Pallas

    x2d = flat.reshape(rows, _LANE)            # contiguous reshape: no HBM traffic
    out2d = pl.pallas_call(
        _bias_kernel,
        out_shape=jax.ShapeDtypeStruct((rows, _LANE), dtype),
        grid_spec=pl.GridSpec(
            grid=(num_tiles,),
            in_specs=[
                pl.BlockSpec(memory_space=pltpu.SMEM),
                pl.BlockSpec((tile_rows, _LANE), lambda i: (i, 0)),
            ],
            out_specs=pl.BlockSpec((tile_rows, _LANE), lambda i: (i, 0)),
        ),
        compiler_params=_compiler_params(),
    )(bias_smem, x2d)
    return out2d.reshape(-1)


def _bias_1d(flat, bias_smem, n, dtype):
    """General path for n % _LANE != 0: 1-D blocks, no pad / slice needed."""
    itemsize = jnp.dtype(dtype).itemsize
    max_elems = max(1024, (_MAX_TILE_BYTES // itemsize) // 1024 * 1024)
    if n <= max_elems:
        block = n                              # full array as one block (no masking)
    else:
        block = max_elems                      # multiple of 1024; ragged last block masked
    num_tiles = _cdiv(n, block)

    return pl.pallas_call(
        _bias_kernel,
        out_shape=jax.ShapeDtypeStruct((n,), dtype),
        grid_spec=pl.GridSpec(
            grid=(num_tiles,),
            in_specs=[
                pl.BlockSpec(memory_space=pltpu.SMEM),
                pl.BlockSpec((block,), lambda i: (i,)),
            ],
            out_specs=pl.BlockSpec((block,), lambda i: (i,)),
        ),
        compiler_params=_compiler_params(),
    )(bias_smem, flat)


def _bias_forward_impl(x, bias):
    """Adds the learned scalar `bias` to every element of `x` (any shape)."""
    orig_shape = x.shape
    n = x.size
    flat = x.reshape(-1)                                   # bitcast, no HBM pass
    bias_smem = jnp.asarray(bias, dtype=jnp.float32).reshape((1,))
    if n % _LANE == 0:
        out_flat = _bias_2d(flat, bias_smem, n, x.dtype)
    else:
        out_flat = _bias_1d(flat, bias_smem, n, x.dtype)
    return out_flat.reshape(orig_shape)


bias_forward = jax.jit(_bias_forward_impl)


if __name__ == "__main__":
    key = jax.random.PRNGKey(0)
    # NCHW activations implied by the module: batch=2, channels=4, 16x16 spatial.
    x = jax.random.normal(key, (2, 4, 16, 16), dtype=jnp.float32)

    # PyTorch initializes bias = zeros(1); use a nonzero value for a meaningful check.
    bias = jnp.full((1,), 0.5, dtype=jnp.float32)

    out = bias_forward(x, bias)
    out = jax.block_until_ready(out)
    expected = x + bias[0]
    assert out.shape == x.shape
    assert out.dtype == x.dtype
    assert jnp.allclose(out, expected, atol=1e-6), "mismatch vs reference (2-D path)"

    # Ragged element count (105 elements) exercises the no-pad 1-D fallback path.
    x2 = jax.random.normal(jax.random.PRNGKey(1), (3, 5, 7), dtype=jnp.float32)
    out2 = jax.block_until_ready(bias_forward(x2, bias))
    assert out2.shape == x2.shape
    assert jnp.allclose(out2, x2 + bias[0], atol=1e-6), "mismatch vs reference (1-D path)"

    print("KERNEL_OK")
</pallas_src>

<mosaic_0001>
module attributes {stable_mosaic.version = 11 : i64} {
  func.func @_bias_kernel(%arg0: i32, %arg1: memref<1xf32, #tpu.memory_space<smem>>, %arg2: memref<4x512xf32, #tpu.memory_space<vmem>>, %arg3: memref<4x512xf32, #tpu.memory_space<vmem>>) attributes {dimension_semantics = [#tpu.dimension_semantics<parallel>], iteration_bounds = array<i64: 1>, scalar_prefetch = 0 : i64, scratch_operands = 0 : i64, tpu.core_type = #tpu.core_type<tc>, window_params = [{transform_indices = @transform_0, window_bounds = array<i64: 1>}, {transform_indices = @transform_1, window_bounds = array<i64: 4, 512>}, {transform_indices = @transform_2, window_bounds = array<i64: 4, 512>}]} {
    %c0 = arith.constant 0 : index
    %c0_0 = arith.constant 0 : index
    %0 = vector.load %arg2[%c0, %c0_0] : memref<4x512xf32, #tpu.memory_space<vmem>>, vector<4x512xf32>
    %c0_1 = arith.constant 0 : index
    %1 = memref.load %arg1[%c0_1] : memref<1xf32, #tpu.memory_space<smem>>
    %2 = vector.broadcast %1 : f32 to vector<4x512xf32>
    %3 = arith.addf %0, %2 : vector<4x512xf32>
    %c0_2 = arith.constant 0 : index
    %c0_3 = arith.constant 0 : index
    %4 = vector.load %arg3[%c0_2, %c0_3] : memref<4x512xf32, #tpu.memory_space<vmem>>, vector<4x512xf32>
    tpu.vector_store %arg3[%c0_2, %c0_3], %3 {strides = array<i32>} : memref<4x512xf32, #tpu.memory_space<vmem>>, vector<4x512xf32>,
    return
  }
  func.func @transform_0(%arg0: i32) -> i32 {
    %c0_i32 = arith.constant 0 : i32
    %c0_i32_0 = arith.constant 0 : i32
    return %c0_i32 : i32
  }
  func.func @transform_1(%arg0: i32) -> (i32, i32) {
    %c0_i32 = arith.constant 0 : i32
    %c0_i32_0 = arith.constant 0 : i32
    return %arg0, %c0_i32 : i32, i32
  }
  func.func @transform_2(%arg0: i32) -> (i32, i32) {
    %c0_i32 = arith.constant 0 : i32
    %c0_i32_0 = arith.constant 0 : i32
    return %arg0, %c0_i32 : i32, i32
  }
}

</mosaic_0001>

<bundles_post_ra>
// kernel: _bias_forward_impl.1
= control target key start
LH: loop header
LB: loop body
LE: loop exit
PB: predicated region body
PF: predicated region fallthrough
CT: control target
= control target key end

     0   :  { %s54_s0 = inlined_call_operand.<no memory space> [shape: f32[1], index: 0, kind: input, shape index: {}]   ;;  %s55_s1 = inlined_call_operand.vmem [shape: f32[4,512], index: 1, kind: input, shape index: {}]   ;;  %s56_s2 = inlined_call_operand.vmem [shape: f32[4,512], index: 2, kind: output, shape index: {}]  }
   0x1   :  { %v12_v0 = vld [vmem:[%s55_s1] sm:$0xff]  ;;  %v15_v1 = vstv %s54_s0  ;;  %v13_v2 = vld [vmem:[%s55_s1 + $0x8] sm:$0xff] }
   0x2   :  { %v16_v3 = vadd.f32 %v15_v1, %v12_v0  ;;  %v17_v4 = vadd.f32 %v15_v1, %v13_v2 }
   0x4   :  { %18 = vst [vmem:[%s56_s2] sm:$0xff] %v16_v3  ;;  %19 = vst [vmem:[%s56_s2 + $0x8] sm:$0xff] %v17_v4 }

</bundles_post_ra>
